<compile_context>
chip_gen: v7x
topology: tpu7x:2x2x1
jax: 0.10.0
libtpu: 0.0.40
codegen_flags: <defaults>
</compile_context>

<pallas_src>
import functools

import jax
import jax.numpy as jnp
from jax import lax
from jax.experimental import pallas as pl
from jax.experimental.pallas import tpu as pltpu


# -----------------------------------------------------------------------------
# Pallas kernel: one image per grid step, layout (H, W*C)
# -----------------------------------------------------------------------------
def _resblk_kernel(x_ref, t1_ref, b1_ref, t2_ref, b2_ref, o_ref, *, H, WC):
    # x_ref : (1, H, W*C) f32      input image (NHWC flattened on last 2 dims)
    # t*_ref: (3, W*C, W*C) bf16   banded conv weights, one band per dy
    # b*_ref: (1, W*C) f32         per-channel bias tiled along W
    # o_ref : (1, H, W*C) f32      output image
    x = x_ref[0]                                            # (H, W*C) f32
    row = lax.broadcasted_iota(jnp.int32, (H, WC), 0)

    def conv3x3(inp_f32, t_ref):
        inp = inp_f32.astype(jnp.bfloat16)                  # bf16 in, f32 acc
        a0 = jnp.dot(inp, t_ref[0], preferred_element_type=jnp.float32)
        a1 = jnp.dot(inp, t_ref[1], preferred_element_type=jnp.float32)
        a2 = jnp.dot(inp, t_ref[2], preferred_element_type=jnp.float32)
        # dy=0 taps read input row h-1 -> shift result down one row, zero row 0
        down = jnp.where(row > 0, pltpu.roll(a0, shift=1, axis=0), 0.0)
        # dy=2 taps read input row h+1 -> shift result up one row, zero row H-1
        up = jnp.where(row < H - 1, pltpu.roll(a2, shift=H - 1, axis=0), 0.0)
        return a1 + down + up                               # (H, W*C) f32

    y1 = conv3x3(x, t1_ref) + b1_ref[...]                   # conv1 + bias1
    y2 = conv3x3(y1, t2_ref) + b2_ref[...]                  # conv2 + bias2
    o_ref[0] = (x + y2).astype(o_ref.dtype)                 # residual add


# -----------------------------------------------------------------------------
# Wrapper: NCHW in / NCHW out, banded weight construction, pallas_call
# -----------------------------------------------------------------------------
def _build_banded(w, W):
    """Fold the 3x3 conv weight (Co, Ci, 3, 3) into 3 banded matrices.

    T[dy][wi*Ci + ci, wo*Co + co] = w[co, ci, dy, wi - wo + 1]
    (zero outside the band), so `x_row (W*Ci) @ T[dy]` applies all dx taps of
    kernel row dy, including the W-direction "same" padding.
    """
    Co, Ci, KH, KW = w.shape
    wi = jnp.arange(W)
    wo = jnp.arange(W)
    dx = jnp.arange(KW)
    # S[dx, wi, wo] = 1  iff  wi == wo + dx - 1
    S = (wi[None, :, None] == (wo[None, None, :] + dx[:, None, None] - KW // 2))
    S = S.astype(jnp.float32)
    # T4[dy, wi, ci, wo, co] = sum_dx S[dx, wi, wo] * w[co, ci, dy, dx]
    T4 = jnp.einsum('xiw,ocyx->yicwo', S, w.astype(jnp.float32))
    return T4.reshape(KH, W * Ci, W * Co)


@jax.jit
def resblk_forward(x_nchw, w1, b1, w2, b2):
    """ResBlk forward. x: (N,C,H,W); w*: (C,C,3,3); b*: (1,C,1,1)."""
    x = jnp.transpose(x_nchw, (0, 2, 3, 1)).astype(jnp.float32)   # NHWC
    N, H, W, C = x.shape
    WC = W * C
    x_flat = x.reshape(N, H, WC)

    t1 = _build_banded(w1, W).astype(jnp.bfloat16)                 # (3, WC, WC)
    t2 = _build_banded(w2, W).astype(jnp.bfloat16)
    b1v = jnp.tile(b1.reshape(-1).astype(jnp.float32), W).reshape(1, WC)
    b2v = jnp.tile(b2.reshape(-1).astype(jnp.float32), W).reshape(1, WC)

    kernel = functools.partial(_resblk_kernel, H=H, WC=WC)

    out_flat = pl.pallas_call(
        kernel,
        out_shape=jax.ShapeDtypeStruct((N, H, WC), jnp.float32),
        grid_spec=pltpu.PrefetchScalarGridSpec(
            num_scalar_prefetch=0,
            grid=(N,),
            in_specs=[
                pl.BlockSpec((1, H, WC), lambda n: (n, 0, 0)),
                pl.BlockSpec((3, WC, WC), lambda n: (0, 0, 0)),
                pl.BlockSpec((1, WC), lambda n: (0, 0)),
                pl.BlockSpec((3, WC, WC), lambda n: (0, 0, 0)),
                pl.BlockSpec((1, WC), lambda n: (0, 0)),
            ],
            out_specs=pl.BlockSpec((1, H, WC), lambda n: (n, 0, 0)),
        ),
        compiler_params=pltpu.CompilerParams(
            dimension_semantics=("parallel",)),
    )(x_flat, t1, b1v, t2, b2v)

    out = out_flat.reshape(N, H, W, C)
    return jnp.transpose(out, (0, 3, 1, 2))                        # back to NCHW


# -----------------------------------------------------------------------------
# Parameter construction (mirrors the module __init__: xavier_normal_, zeros)
# -----------------------------------------------------------------------------
def xavier_normal(key, shape):
    fan_in = shape[1] * shape[2] * shape[3]
    fan_out = shape[0] * shape[2] * shape[3]
    std = (2.0 / (fan_in + fan_out)) ** 0.5
    return std * jax.random.normal(key, shape, dtype=jnp.float32)


# -----------------------------------------------------------------------------
# Pure-JAX reference (lax conv) for a correctness check
# -----------------------------------------------------------------------------
def ref_forward(x, w1, b1, w2, b2, mxu_dtype=None):
    def conv(x_, w_):
        return lax.conv_general_dilated(
            x_, w_, window_strides=(1, 1), padding="SAME",
            dimension_numbers=("NCHW", "OIHW", "NCHW"))

    def q(a):
        if mxu_dtype is None:
            return a
        return a.astype(mxu_dtype).astype(jnp.float32)

    y1 = conv(q(x), q(w1)) + b1
    y2 = conv(q(y1), q(w2)) + b2
    return x + y2


if __name__ == "__main__":
    N, C, H, W = 2, 16, 16, 16          # batch=2, ch=16 (module default), 16x16
    K = 3

    key = jax.random.PRNGKey(0)
    kx, kw1, kw2 = jax.random.split(key, 3)

    x = jax.random.normal(kx, (N, C, H, W), dtype=jnp.float32)
    w1 = xavier_normal(kw1, (C, C, K, K))
    w2 = xavier_normal(kw2, (C, C, K, K))
    b1 = jnp.zeros((1, C, 1, 1), jnp.float32)   # CONST0 init
    b2 = jnp.zeros((1, C, 1, 1), jnp.float32)

    out = jax.block_until_ready(resblk_forward(x, w1, b1, w2, b2))
    assert out.shape == (N, C, H, W)

    # Tight check vs a reference using the same bf16-operand / f32-accumulate
    # precision policy, plus a loose sanity check vs a pure-f32 reference.
    ref_bf16 = jax.block_until_ready(
        ref_forward(x, w1, b1, w2, b2, mxu_dtype=jnp.bfloat16))
    ref_f32 = jax.block_until_ready(ref_forward(x, w1, b1, w2, b2))
    assert jnp.allclose(out, ref_bf16, atol=1e-3, rtol=1e-3), "mismatch (bf16 ref)"
    assert jnp.allclose(out, ref_f32, atol=1e-1, rtol=1e-1), "mismatch (f32 ref)"

    print("KERNEL_OK")
</pallas_src>

<mosaic_0001>
module attributes {stable_mosaic.version = 11 : i64} {
  func.func @_resblk_kernel(%arg0: i32, %arg1: memref<1x16x256xf32, #tpu.memory_space<vmem>>, %arg2: memref<3x256x256xbf16, #tpu.memory_space<vmem>>, %arg3: memref<1x256xf32, #tpu.memory_space<vmem>>, %arg4: memref<3x256x256xbf16, #tpu.memory_space<vmem>>, %arg5: memref<1x256xf32, #tpu.memory_space<vmem>>, %arg6: memref<1x16x256xf32, #tpu.memory_space<vmem>>) attributes {dimension_semantics = [#tpu.dimension_semantics<parallel>], iteration_bounds = array<i64: 2>, scalar_prefetch = 0 : i64, scratch_operands = 0 : i64, tpu.core_type = #tpu.core_type<tc>, window_params = [{transform_indices = @transform_0, window_bounds = array<i64: 1, 16, 256>}, {pipeline_mode = #tpu.pipeline_mode<synchronous>, transform_indices = @transform_1, window_bounds = array<i64: 3, 256, 256>}, {pipeline_mode = #tpu.pipeline_mode<synchronous>, transform_indices = @transform_2, window_bounds = array<i64: 1, 256>}, {pipeline_mode = #tpu.pipeline_mode<synchronous>, transform_indices = @transform_3, window_bounds = array<i64: 3, 256, 256>}, {pipeline_mode = #tpu.pipeline_mode<synchronous>, transform_indices = @transform_4, window_bounds = array<i64: 1, 256>}, {transform_indices = @transform_5, window_bounds = array<i64: 1, 16, 256>}]} {
    %c0 = arith.constant 0 : index
    %c0_0 = arith.constant 0 : index
    %c0_1 = arith.constant 0 : index
    %0 = vector.load %arg1[%c0, %c0_0, %c0_1] : memref<1x16x256xf32, #tpu.memory_space<vmem>>, vector<1x16x256xf32>
    %1 = vector.shape_cast %0 : vector<1x16x256xf32> to vector<16x256xf32>
    %2 = tpu.iota {dimensions = array<i32: 0>} : vector<16x256xi32>
    %3 = arith.truncf %1 : vector<16x256xf32> to vector<16x256xbf16>
    %c0_2 = arith.constant 0 : index
    %c0_3 = arith.constant 0 : index
    %c0_4 = arith.constant 0 : index
    %4 = vector.load %arg2[%c0_2, %c0_3, %c0_4] : memref<3x256x256xbf16, #tpu.memory_space<vmem>>, vector<1x256x256xbf16>
    %5 = vector.shape_cast %4 : vector<1x256x256xbf16> to vector<256x256xbf16>
    %cst = arith.constant dense<0.000000e+00> : vector<16x256xf32>
    %6 = tpu.matmul %3, %5, %cst {dimension_numbers = #tpu.dot_dimension_numbers<[1], [0], [0], [1], [0, 0, 1, 1], [], []>} : vector<16x256xbf16>, vector<256x256xbf16>, vector<16x256xf32> -> vector<16x256xf32>
    %c1 = arith.constant 1 : index
    %c0_5 = arith.constant 0 : index
    %c0_6 = arith.constant 0 : index
    %7 = vector.load %arg2[%c1, %c0_5, %c0_6] : memref<3x256x256xbf16, #tpu.memory_space<vmem>>, vector<1x256x256xbf16>
    %8 = vector.shape_cast %7 : vector<1x256x256xbf16> to vector<256x256xbf16>
    %cst_7 = arith.constant dense<0.000000e+00> : vector<16x256xf32>
    %9 = tpu.matmul %3, %8, %cst_7 {dimension_numbers = #tpu.dot_dimension_numbers<[1], [0], [0], [1], [0, 0, 1, 1], [], []>} : vector<16x256xbf16>, vector<256x256xbf16>, vector<16x256xf32> -> vector<16x256xf32>
    %c2 = arith.constant 2 : index
    %c0_8 = arith.constant 0 : index
    %c0_9 = arith.constant 0 : index
    %10 = vector.load %arg2[%c2, %c0_8, %c0_9] : memref<3x256x256xbf16, #tpu.memory_space<vmem>>, vector<1x256x256xbf16>
    %11 = vector.shape_cast %10 : vector<1x256x256xbf16> to vector<256x256xbf16>
    %cst_10 = arith.constant dense<0.000000e+00> : vector<16x256xf32>
    %12 = tpu.matmul %3, %11, %cst_10 {dimension_numbers = #tpu.dot_dimension_numbers<[1], [0], [0], [1], [0, 0, 1, 1], [], []>} : vector<16x256xbf16>, vector<256x256xbf16>, vector<16x256xf32> -> vector<16x256xf32>
    %c0_i32 = arith.constant 0 : i32
    %13 = vector.broadcast %c0_i32 : i32 to vector<16x256xi32>
    %14 = arith.cmpi sgt, %2, %13 : vector<16x256xi32>
    %c1_i32 = arith.constant 1 : i32
    %15 = tpu.dynamic_rotate %6 by %c1_i32 dim 0 : vector<16x256xf32>, i32 -> vector<16x256xf32>
    %cst_11 = arith.constant 0.000000e+00 : f32
    %16 = vector.broadcast %cst_11 : f32 to vector<16x256xf32>
    %17 = arith.select %14, %15, %16 : vector<16x256xi1>, vector<16x256xf32>
    %c15_i32 = arith.constant 15 : i32
    %18 = vector.broadcast %c15_i32 : i32 to vector<16x256xi32>
    %19 = arith.cmpi slt, %2, %18 : vector<16x256xi32>
    %c15_i32_12 = arith.constant 15 : i32
    %20 = tpu.dynamic_rotate %12 by %c15_i32_12 dim 0 : vector<16x256xf32>, i32 -> vector<16x256xf32>
    %cst_13 = arith.constant 0.000000e+00 : f32
    %21 = vector.broadcast %cst_13 : f32 to vector<16x256xf32>
    %22 = arith.select %19, %20, %21 : vector<16x256xi1>, vector<16x256xf32>
    %23 = arith.addf %9, %17 : vector<16x256xf32>
    %24 = arith.addf %23, %22 : vector<16x256xf32>
    %c0_14 = arith.constant 0 : index
    %c0_15 = arith.constant 0 : index
    %25 = vector.load %arg3[%c0_14, %c0_15] : memref<1x256xf32, #tpu.memory_space<vmem>>, vector<1x256xf32>
    %26 = vector.broadcast %25 : vector<1x256xf32> to vector<16x256xf32>
    %27 = arith.addf %24, %26 : vector<16x256xf32>
    %28 = arith.truncf %27 : vector<16x256xf32> to vector<16x256xbf16>
    %c0_16 = arith.constant 0 : index
    %c0_17 = arith.constant 0 : index
    %c0_18 = arith.constant 0 : index
    %29 = vector.load %arg4[%c0_16, %c0_17, %c0_18] : memref<3x256x256xbf16, #tpu.memory_space<vmem>>, vector<1x256x256xbf16>
    %30 = vector.shape_cast %29 : vector<1x256x256xbf16> to vector<256x256xbf16>
    %cst_19 = arith.constant dense<0.000000e+00> : vector<16x256xf32>
    %31 = tpu.matmul %28, %30, %cst_19 {dimension_numbers = #tpu.dot_dimension_numbers<[1], [0], [0], [1], [0, 0, 1, 1], [], []>} : vector<16x256xbf16>, vector<256x256xbf16>, vector<16x256xf32> -> vector<16x256xf32>
    %c1_20 = arith.constant 1 : index
    %c0_21 = arith.constant 0 : index
    %c0_22 = arith.constant 0 : index
    %32 = vector.load %arg4[%c1_20, %c0_21, %c0_22] : memref<3x256x256xbf16, #tpu.memory_space<vmem>>, vector<1x256x256xbf16>
    %33 = vector.shape_cast %32 : vector<1x256x256xbf16> to vector<256x256xbf16>
    %cst_23 = arith.constant dense<0.000000e+00> : vector<16x256xf32>
    %34 = tpu.matmul %28, %33, %cst_23 {dimension_numbers = #tpu.dot_dimension_numbers<[1], [0], [0], [1], [0, 0, 1, 1], [], []>} : vector<16x256xbf16>, vector<256x256xbf16>, vector<16x256xf32> -> vector<16x256xf32>
    %c2_24 = arith.constant 2 : index
    %c0_25 = arith.constant 0 : index
    %c0_26 = arith.constant 0 : index
    %35 = vector.load %arg4[%c2_24, %c0_25, %c0_26] : memref<3x256x256xbf16, #tpu.memory_space<vmem>>, vector<1x256x256xbf16>
    %36 = vector.shape_cast %35 : vector<1x256x256xbf16> to vector<256x256xbf16>
    %cst_27 = arith.constant dense<0.000000e+00> : vector<16x256xf32>
    %37 = tpu.matmul %28, %36, %cst_27 {dimension_numbers = #tpu.dot_dimension_numbers<[1], [0], [0], [1], [0, 0, 1, 1], [], []>} : vector<16x256xbf16>, vector<256x256xbf16>, vector<16x256xf32> -> vector<16x256xf32>
    %c0_i32_28 = arith.constant 0 : i32
    %38 = vector.broadcast %c0_i32_28 : i32 to vector<16x256xi32>
    %39 = arith.cmpi sgt, %2, %38 : vector<16x256xi32>
    %c1_i32_29 = arith.constant 1 : i32
    %40 = tpu.dynamic_rotate %31 by %c1_i32_29 dim 0 : vector<16x256xf32>, i32 -> vector<16x256xf32>
    %cst_30 = arith.constant 0.000000e+00 : f32
    %41 = vector.broadcast %cst_30 : f32 to vector<16x256xf32>
    %42 = arith.select %39, %40, %41 : vector<16x256xi1>, vector<16x256xf32>
    %c15_i32_31 = arith.constant 15 : i32
    %43 = vector.broadcast %c15_i32_31 : i32 to vector<16x256xi32>
    %44 = arith.cmpi slt, %2, %43 : vector<16x256xi32>
    %c15_i32_32 = arith.constant 15 : i32
    %45 = tpu.dynamic_rotate %37 by %c15_i32_32 dim 0 : vector<16x256xf32>, i32 -> vector<16x256xf32>
    %cst_33 = arith.constant 0.000000e+00 : f32
    %46 = vector.broadcast %cst_33 : f32 to vector<16x256xf32>
    %47 = arith.select %44, %45, %46 : vector<16x256xi1>, vector<16x256xf32>
    %48 = arith.addf %34, %42 : vector<16x256xf32>
    %49 = arith.addf %48, %47 : vector<16x256xf32>
    %c0_34 = arith.constant 0 : index
    %c0_35 = arith.constant 0 : index
    %50 = vector.load %arg5[%c0_34, %c0_35] : memref<1x256xf32, #tpu.memory_space<vmem>>, vector<1x256xf32>
    %51 = vector.broadcast %50 : vector<1x256xf32> to vector<16x256xf32>
    %52 = arith.addf %49, %51 : vector<16x256xf32>
    %53 = arith.addf %1, %52 : vector<16x256xf32>
    %c0_36 = arith.constant 0 : index
    %c0_37 = arith.constant 0 : index
    %c0_38 = arith.constant 0 : index
    %54 = vector.load %arg6[%c0_36, %c0_37, %c0_38] : memref<1x16x256xf32, #tpu.memory_space<vmem>>, vector<1x16x256xf32>
    %55 = vector.shape_cast %54 : vector<1x16x256xf32> to vector<16x256xf32>
    %56 = vector.shape_cast %53 : vector<16x256xf32> to vector<1x16x256xf32>
    tpu.vector_store %arg6[%c0_36, %c0_37, %c0_38], %56 {strides = array<i32>} : memref<1x16x256xf32, #tpu.memory_space<vmem>>, vector<1x16x256xf32>,
    return
  }
  func.func @transform_0(%arg0: i32) -> (i32, i32, i32) {
    %c0_i32 = arith.constant 0 : i32
    %c0_i32_0 = arith.constant 0 : i32
    %c0_i32_1 = arith.constant 0 : i32
    return %arg0, %c0_i32, %c0_i32_0 : i32, i32, i32
  }
  func.func @transform_1(%arg0: i32) -> (i32, i32, i32) {
    %c0_i32 = arith.constant 0 : i32
    %c0_i32_0 = arith.constant 0 : i32
    %c0_i32_1 = arith.constant 0 : i32
    %c0_i32_2 = arith.constant 0 : i32
    return %c0_i32, %c0_i32_0, %c0_i32_1 : i32, i32, i32
  }
  func.func @transform_2(%arg0: i32) -> (i32, i32) {
    %c0_i32 = arith.constant 0 : i32
    %c0_i32_0 = arith.constant 0 : i32
    %c0_i32_1 = arith.constant 0 : i32
    return %c0_i32, %c0_i32_0 : i32, i32
  }
  func.func @transform_3(%arg0: i32) -> (i32, i32, i32) {
    %c0_i32 = arith.constant 0 : i32
    %c0_i32_0 = arith.constant 0 : i32
    %c0_i32_1 = arith.constant 0 : i32
    %c0_i32_2 = arith.constant 0 : i32
    return %c0_i32, %c0_i32_0, %c0_i32_1 : i32, i32, i32
  }
  func.func @transform_4(%arg0: i32) -> (i32, i32) {
    %c0_i32 = arith.constant 0 : i32
    %c0_i32_0 = arith.constant 0 : i32
    %c0_i32_1 = arith.constant 0 : i32
    return %c0_i32, %c0_i32_0 : i32, i32
  }
  func.func @transform_5(%arg0: i32) -> (i32, i32, i32) {
    %c0_i32 = arith.constant 0 : i32
    %c0_i32_0 = arith.constant 0 : i32
    %c0_i32_1 = arith.constant 0 : i32
    return %arg0, %c0_i32, %c0_i32_0 : i32, i32, i32
  }
}

</mosaic_0001>

<bundles_post_ra>
// kernel: tile.10
= control target key start
LH: loop header
LB: loop body
LE: loop exit
PB: predicated region body
PF: predicated region fallthrough
CT: control target
= control target key end

     0   :  { %s28_s0 = inlined_call_operand.vmem [shape: f32[16], index: 0, kind: input, shape index: {}]   ;;  %s29_s1 = inlined_call_operand.vmem [shape: f32[16,16], index: 1, kind: output, shape index: {}]  }
   0x1   :  { %v4_v0 = vld [vmem:[%s28_s0] ss:$0 sm:$0xff] }
   0x2   :  { %5 = vst [vmem:[%s29_s1] sm:$0xff] %v4_v0  ;;  %8 = vst [vmem:[%s29_s1 + $0x8] sm:$0xff] %v4_v0 }

// kernel: tile.11
= control target key start
LH: loop header
LB: loop body
LE: loop exit
PB: predicated region body
PF: predicated region fallthrough
CT: control target
= control target key end

     0   :  { %s7_s6 = smov 3  ;;  %s21_s9 = smov 3  ;;  %vm4_vm0 = vcmask 130048   ;;  %vm11_vm1 = vcmask 1048448   ;;  %vm18_vm2 = vcmask 917248   ;;  %vm25_vm3 = vcmask 786048   ;;  %s128_s0 = inlined_call_operand.vmem [shape: f32[16,16], index: 0, kind: input, shape index: {}]   ;;  %s129_s1 = inlined_call_operand.vmem [shape: f32[1,256], index: 1, kind: output, shape index: {}]  }
   0x1   :  { %v66_v0 = vld [vmem:[%s128_s0 + $0x7] ss:$8 sm:%s7_s6]   ;;  %s81_s10 = smov 112   ;;  %v68_v1 = vld [vmem:[%s128_s0 + $0x5] ss:$8 sm:%s21_s9]   ;;  %s14_s13 = smov 3 }
   0x2   :  { %9 = vrot.lane.b32.xlu0 %v66_v0, %s81_s10  ;;  %s82_s14 = smov 80   ;;  %v67_v2 = vld [vmem:[%s128_s0 + $0x6] ss:$8 sm:%s14_s13]   ;;  %s28_s17 = smov 3  ;;  %vm32_vm4 = vcmask 654848   ;;  %vm39_vm5 = vcmask 523648  }
   0x3   :  { %23 = vrot.lane.b32.xlu1 %v68_v1, %s82_s14  ;;  %v69_v3 = vld [vmem:[%s128_s0 + $0x4] ss:$8 sm:%s28_s17]   ;;  %s35_s20 = smov 3  ;;  %s42_s21 = smov 3  ;;  %vm46_vm6 = vcmask 392448   ;;  %vm53_vm7 = vcmask 261248  }
   0x4   :  { %s83_s22 = smov 96   ;;  %s84_s23 = smov 64   ;;  %v70_v4 = vld [vmem:[%s128_s0 + $0x3] ss:$8 sm:%s35_s20]   ;;  %v71_v5 = vld [vmem:[%s128_s0 + $0x2] ss:$8 sm:%s42_s21]  }
   0x5   :  { %s2_s26 = smov 3  ;;  %s49_s29 = smov 3 }
   0x6   :  { %16 = vrot.lane.b32.xlu0 %v67_v2, %s83_s22  ;;  %v3_v6 = vld [vmem:[%s128_s0] ss:$8 sm:%s2_s26]   ;;  %s85_s3 = smov 48   ;;  %s86_s4 = smov 32  }
   0x7   :  { %30 = vrot.lane.b32.xlu1 %v69_v3, %s84_s23  ;;  %5 = vst.msk [vmem:[#allocation0] ss:$8 sm:$0x3] %vm4_vm0, %v3_v6   ;;  %v72_v7 = vld [vmem:[%s128_s0 + $0x1] ss:$8 sm:%s49_s29]   ;;  %s87_s0 = smov 16  }
   0xa   :  { %37 = vrot.lane.b32.xlu0 %v70_v4, %s85_s3 }
   0xb   :  { %44 = vrot.lane.b32.xlu1 %v71_v5, %s86_s4 }
   0xe   :  { %51 = vrot.lane.b32.xlu0 %v72_v7, %s87_s0 }
  0x74   :  { %v10_v8 = vpop.permute.xlu0 %9  }
  0x75   :  { %12 = vst.msk [vmem:[#allocation0] ss:$8 sm:$0x3] %vm11_vm1, %v10_v8   ;;  %v24_v9 = vpop.permute.xlu1 %23  }
  0x78   :  { %v17_v10 = vpop.permute.xlu0 %16  }
  0x79   :  { %19 = vst.msk [vmem:[#allocation0] ss:$8 sm:$0x3] %vm18_vm2, %v17_v10   ;;  %v31_v11 = vpop.permute.xlu1 %30  }
  0x7a   :  { %26 = vst.msk [vmem:[#allocation0] ss:$8 sm:$0x3] %vm25_vm3, %v24_v9  }
  0x7b   :  { %33 = vst.msk [vmem:[#allocation0] ss:$8 sm:$0x3] %vm32_vm4, %v31_v11  }
  0x7c   :  { %v38_v12 = vpop.permute.xlu0 %37  }
  0x7d   :  { %40 = vst.msk [vmem:[#allocation0] ss:$8 sm:$0x3] %vm39_vm5, %v38_v12   ;;  %v45_v13 = vpop.permute.xlu1 %44  }
  0x7e   :  { %47 = vst.msk [vmem:[#allocation0] ss:$8 sm:$0x3] %vm46_vm6, %v45_v13  }
  0x80   :  { %v52_v14 = vpop.permute.xlu0 %51  }
  0x81   :  { %54 = vst.msk [vmem:[#allocation0] ss:$8 sm:$0x3] %vm53_vm7, %v52_v14  }
  0x88   :  { %v58_v15 = vld [vmem:[#allocation0] sm:$0x1]  ;;  %v62_v16 = vld [vmem:[#allocation0 + $0x8] sm:$0x1] }
  0x89   :  { %60 = vst [vmem:[%s129_s1] sm:$0x1] %v58_v15  ;;  %73 = vst [vmem:[%s129_s1 + $0x1] sm:$0x1] %v62_v16 }

// kernel: resblk_forward.1
= control target key start
LH: loop header
LB: loop body
LE: loop exit
PB: predicated region body
PF: predicated region fallthrough
CT: control target
= control target key end

     0   :  { %s2476_s18 = smov 0   ;;  %s3180_s0 = inlined_call_operand.vmem [shape: f32[2,16,256], index: 0, kind: input, shape index: {}]   ;;  %s3181_s1 = inlined_call_operand.vmem [shape: bf16[3,256,256], index: 1, kind: input, shape index: {}]   ;;  %s3182_s2 = inlined_call_operand.vmem [shape: f32[1,256], index: 2, kind: input, shape index: {}]   ;;  %s3183_s3 = inlined_call_operand.vmem [shape: bf16[3,256,256], index: 3, kind: input, shape index: {}]   ;;  %s3184_s4 = inlined_call_operand.vmem [shape: f32[1,256], index: 4, kind: input, shape index: {}]   ;;  %s3185_s5 = inlined_call_operand.vmem [shape: f32[2,16,256], index: 5, kind: output, shape index: {}]  }
   0x1 LB: > { %s1807_s19 = sadd.s32 4294967295, %s2444_s18   ;;  %p1811_p0 = scmp.ge.s32.totalorder %s2444_s18, 1  ;;  %s2444_s18 = sphi %s2476_s18, %s15_s18  }
   0x2   : > { %p187_p1 = scmp.lt.s32.totalorder %s2444_s18, 3 }
   0x4   : > { %p188_p2 = pnand %p1811_p0, %p187_p1 }
   0x5   : > { %v2148_v0 = vld [vmem:[%s3181_s1 + $0x4] ss:$8 sps:$4 sm:$0xff] (!%p188_p2)   ;;  %v2150_v1 = vld [vmem:[%s3181_s1] ss:$8 sps:$4 sm:$0xff] (!%p188_p2)   ;;  %v2151_v2 = vld [vmem:[%s3181_s1 + $0x14] ss:$8 sps:$4 sm:$0xff] (!%p188_p2)  }
   0x6   : > { %191 = sbr.rel (%p188_p2) target bundleno = 646 (0x286), region = 40  ;;  %426 = vmatprep.subr.bf16.mxu0 (!%p188_p2), %v2148_v0  ;;  %v2153_v3 = vld [vmem:[%s3181_s1 + $0x10] ss:$8 sps:$4 sm:$0xff] (!%p188_p2)   ;;  %v2154_v4 = vld [vmem:[%s3181_s1 + $0x24] ss:$8 sps:$4 sm:$0xff] (!%p188_p2)   ;;  %p215_p3 = scmp.lt.s32.totalorder (!%p188_p2), %s1807_s19, 1 }
   0x7   : > { %427 = vmatpush1.bf16.msra.mxu0 (!%p188_p2), %v2150_v1  ;;  %v2156_v5 = vld [vmem:[%s3181_s1 + $0x20] ss:$8 sps:$4 sm:$0xff] (!%p188_p2)   ;;  %v2157_v6 = vld [vmem:[%s3181_s1 + $0x34] ss:$8 sps:$4 sm:$0xff] (!%p188_p2)   ;;  %v2159_v7 = vld [vmem:[%s3181_s1 + $0x30] ss:$8 sps:$4 sm:$0xff] (!%p188_p2)  }
   0x8   : > { %428 = vmatprep.subr.bf16.mxu0 (!%p188_p2), %v2151_v2  ;;  %v2160_v8 = vld [vmem:[%s3181_s1 + $0x44] ss:$8 sps:$4 sm:$0xff] (!%p188_p2)   ;;  %v2162_v9 = vld [vmem:[%s3181_s1 + $0x40] ss:$8 sps:$4 sm:$0xff] (!%p188_p2)   ;;  %v2163_v10 = vld [vmem:[%s3181_s1 + $0x54] ss:$8 sps:$4 sm:$0xff] (!%p188_p2)  }
   0x9   : > { %v2165_v11 = vld [vmem:[%s3181_s1 + $0x50] ss:$8 sps:$4 sm:$0xff] (!%p188_p2)   ;;  %v2166_v12 = vld [vmem:[%s3181_s1 + $0x64] ss:$8 sps:$4 sm:$0xff] (!%p188_p2)   ;;  %v2168_v14 = vld [vmem:[%s3181_s1 + $0x60] ss:$8 sps:$4 sm:$0xff] (!%p188_p2)  }
   0xa   : > { %v2193_v13 = vld [vmem:[%s3181_s1 + $0x204] ss:$8 sps:$4 sm:$0xff] (!%p188_p2)   ;;  %v2197_v15 = vld [vmem:[%s3181_s1 + $0x200] ss:$8 sps:$4 sm:$0xff] (!%p188_p2)   ;;  %v2169_v18 = vld [vmem:[%s3181_s1 + $0x74] ss:$8 sps:$4 sm:$0xff] (!%p188_p2)  }
   0xb   : > { %429 = vmatpush1.bf16.msra.mxu0 (!%p188_p2), %v2153_v3  ;;  %695 = vmatprep.subr.bf16.mxu1 (!%p188_p2), %v2193_v13  ;;  %v2199_v20 = vld [vmem:[%s3181_s1 + $0x214] ss:$8 sps:$4 sm:$0xff] (!%p188_p2)   ;;  %v2201_v21 = vld [vmem:[%s3181_s1 + $0x210] ss:$8 sps:$4 sm:$0xff] (!%p188_p2)   ;;  %v2172_v23 = vld [vmem:[%s3181_s1 + $0x84] ss:$8 sps:$4 sm:$0xff] (!%p188_p2)  }
   0xc   : > { %430 = vmatprep.subr.bf16.mxu0 (!%p188_p2), %v2154_v4  ;;  %696 = vmatpush1.bf16.msra.mxu1 (!%p188_p2), %v2197_v15  ;;  %v2171_v22 = vld [vmem:[%s3181_s1 + $0x70] ss:$8 sps:$4 sm:$0xff] (!%p188_p2)   ;;  %v2205_v24 = vld [vmem:[%s3181_s1 + $0x224] ss:$8 sps:$4 sm:$0xff] (!%p188_p2)   ;;  %v2207_v25 = vld [vmem:[%s3181_s1 + $0x220] ss:$8 sps:$4 sm:$0xff] (!%p188_p2)  }
   0xd   : > { %s3187_s19 = smov (!%p215_p3, %s1807_s19), 1  ;;  %697 = vmatprep.subr.bf16.mxu1 %v2199_v20  ;;  %v2211_v26 = vld [vmem:[%s3181_s1 + $0x234] ss:$8 sps:$4 sm:$0xff]   ;;  %v2174_v27 = vld [vmem:[%s3181_s1 + $0x80] ss:$8 sps:$4 sm:$0xff]  }
   0xe   : > { %s2138_s17 = sshll.u32 %s3187_s19, 5  ;;  %v2175_v28 = vld [vmem:[%s3181_s1 + $0x94] ss:$8 sps:$4 sm:$0xff]   ;;  %v2213_v29 = vld [vmem:[%s3181_s1 + $0x230] ss:$8 sps:$4 sm:$0xff]  }
   0xf   : > { %431 = vmatpush1.bf16.msra.mxu0 %v2156_v5  ;;  %s2531_s26 = scalar_lea.vmem %s3180_s0, %s2138_s17  ;;  %v2217_v30 = vld [vmem:[%s3181_s1 + $0x244] ss:$8 sps:$4 sm:$0xff]   ;;  %v2177_v31 = vld [vmem:[%s3181_s1 + $0x90] ss:$8 sps:$4 sm:$0xff]   ;;  %v2219_v33 = vld [vmem:[%s3181_s1 + $0x240] ss:$8 sps:$4 sm:$0xff]   ;;  %s224_s9 = scalar_lea.vmem %s3185_s5, %s2138_s17 }
  0x10   : > { %432 = vmatprep.subr.bf16.mxu0 %v2157_v6  ;;  %v226_v16 = vld [vmem:[%s2531_s26 + $0x8] sm:$0xff]  ;;  %v228_v17 = vld [vmem:[%s2531_s26 + $0x18] sm:$0xff]  ;;  %698 = vmatpush1.bf16.msra.mxu1 %v2201_v21  ;;  %v2660_v56 = vld [vmem:[%s2531_s26] sm:$0xff] }
  0x11   : > { %v2547_v19 = vpack.c.bf16 %v228_v17, %v226_v16  ;;  %699 = vmatprep.subr.bf16.mxu1 %v2205_v24  ;;  %v2178_v32 = vld [vmem:[%s3181_s1 + $0xa4] ss:$8 sps:$4 sm:$0xff]   ;;  %v2223_v34 = vld [vmem:[%s3181_s1 + $0x254] ss:$8 sps:$4 sm:$0xff]   ;;  %v2180_v35 = vld [vmem:[%s3181_s1 + $0xa0] ss:$8 sps:$4 sm:$0xff]  }
  0x12   : > { %v2181_v36 = vld [vmem:[%s3181_s1 + $0xb4] ss:$8 sps:$4 sm:$0xff]   ;;  %v2225_v37 = vld [vmem:[%s3181_s1 + $0x250] ss:$8 sps:$4 sm:$0xff]   ;;  %v2229_v38 = vld [vmem:[%s3181_s1 + $0x264] ss:$8 sps:$4 sm:$0xff]  }
  0x13   : > { %433 = vmatpush1.bf16.msra.mxu0 %v2159_v7  ;;  %458 = vmatprep.mubr.bf16.mxu0 %v2547_v19  ;;  %v2183_v39 = vld [vmem:[%s3181_s1 + $0xb0] ss:$8 sps:$4 sm:$0xff]   ;;  %v2184_v40 = vld [vmem:[%s3181_s1 + $0xc4] ss:$8 sps:$4 sm:$0xff]   ;;  %v2231_v41 = vld [vmem:[%s3181_s1 + $0x260] ss:$8 sps:$4 sm:$0xff]  }
  0x14   : > { %434 = vmatprep.subr.bf16.mxu0 %v2160_v8  ;;  %727 = vmatprep.mubr.bf16.mxu1 %v2547_v19  ;;  %v2235_v42 = vld [vmem:[%s3181_s1 + $0x274] ss:$8 sps:$4 sm:$0xff]   ;;  %v2186_v43 = vld [vmem:[%s3181_s1 + $0xc0] ss:$8 sps:$4 sm:$0xff]   ;;  %v2237_v45 = vld [vmem:[%s3181_s1 + $0x270] ss:$8 sps:$4 sm:$0xff]  }
  0x15   : > { %700 = vmatpush1.bf16.msra.mxu1 %v2207_v25  ;;  %v2187_v44 = vld [vmem:[%s3181_s1 + $0xd4] ss:$8 sps:$4 sm:$0xff]   ;;  %v2241_v46 = vld [vmem:[%s3181_s1 + $0x284] ss:$8 sps:$4 sm:$0xff]   ;;  %v2189_v47 = vld [vmem:[%s3181_s1 + $0xd0] ss:$8 sps:$4 sm:$0xff]  }
  0x16   : > { %701 = vmatprep.subr.bf16.mxu1 %v2211_v26  ;;  %v2190_v48 = vld [vmem:[%s3181_s1 + $0xe4] ss:$8 sps:$4 sm:$0xff]   ;;  %v2243_v49 = vld [vmem:[%s3181_s1 + $0x280] ss:$8 sps:$4 sm:$0xff]   ;;  %v2247_v50 = vld [vmem:[%s3181_s1 + $0x294] ss:$8 sps:$4 sm:$0xff]  }
  0x17   : > { %435 = vmatpush1.bf16.msra.mxu0 %v2162_v9  ;;  %v2192_v51 = vld [vmem:[%s3181_s1 + $0xe0] ss:$8 sps:$4 sm:$0xff]   ;;  %v2195_v52 = vld [vmem:[%s3181_s1 + $0xf4] ss:$8 sps:$4 sm:$0xff]   ;;  %v2249_v53 = vld [vmem:[%s3181_s1 + $0x290] ss:$8 sps:$4 sm:$0xff]  }
  0x18   : > { %436 = vmatprep.subr.bf16.mxu0 %v2163_v10  ;;  %v2253_v54 = vld [vmem:[%s3181_s1 + $0x2a4] ss:$8 sps:$4 sm:$0xff]   ;;  %v2198_v55 = vld [vmem:[%s3181_s1 + $0xf0] ss:$8 sps:$4 sm:$0xff]   ;;  %v2255_v59 = vld [vmem:[%s3181_s1 + $0x2a0] ss:$8 sps:$4 sm:$0xff]  }
  0x19   : > { %702 = vmatpush1.bf16.msra.mxu1 %v2213_v29  ;;  %v2663_v57 = vld [vmem:[%s2531_s26 + $0x10] sm:$0xff]  ;;  %v2204_v58 = vld [vmem:[%s3181_s1 + $0x104] ss:$8 sps:$4 sm:$0xff]   ;;  %v2202_v62 = vld [vmem:[%s3181_s1 + $0x100] ss:$8 sps:$4 sm:$0xff]  }
  0x1a   : > { %703 = vmatprep.subr.bf16.mxu1 %v2217_v30  ;;  %v2259_v60 = vld [vmem:[%s3181_s1 + $0x2b4] ss:$8 sps:$4 sm:$0xff]   ;;  %v2676_v61 = vpack.c.bf16 %v2663_v57, %v2660_v56  ;;  %v2261_v0 = vld [vmem:[%s3181_s1 + $0x2b0] ss:$8 sps:$4 sm:$0xff]   ;;  %v2265_v2 = vld [vmem:[%s3181_s1 + $0x2c4] ss:$8 sps:$4 sm:$0xff]  }
  0x1b   : > { %437 = vmatpush1.bf16.msra.mxu0 %v2165_v11  ;;  %v2210_v63 = vld [vmem:[%s3181_s1 + $0x114] ss:$8 sps:$4 sm:$0xff]   ;;  %v2208_v1 = vld [vmem:[%s3181_s1 + $0x110] ss:$8 sps:$4 sm:$0xff]   ;;  %v2216_v3 = vld [vmem:[%s3181_s1 + $0x124] ss:$8 sps:$4 sm:$0xff]  }
  0x1c   : > { %438 = vmatprep.subr.bf16.mxu0 %v2166_v12  ;;  %v2267_v4 = vld [vmem:[%s3181_s1 + $0x2c0] ss:$8 sps:$4 sm:$0xff]   ;;  %v2271_v5 = vld [vmem:[%s3181_s1 + $0x2d4] ss:$8 sps:$4 sm:$0xff]   ;;  %v2273_v8 = vld [vmem:[%s3181_s1 + $0x2d0] ss:$8 sps:$4 sm:$0xff]  }
  0x1d   : > { %704 = vmatpush1.bf16.msra.mxu1 %v2219_v33  ;;  %v2214_v6 = vld [vmem:[%s3181_s1 + $0x120] ss:$8 sps:$4 sm:$0xff]   ;;  %v2222_v7 = vld [vmem:[%s3181_s1 + $0x134] ss:$8 sps:$4 sm:$0xff]   ;;  %v2277_v9 = vld [vmem:[%s3181_s1 + $0x2e4] ss:$8 sps:$4 sm:$0xff]  }
  0x1e   : > { %705 = vmatprep.subr.bf16.mxu1 %v2223_v34  ;;  %v2220_v10 = vld [vmem:[%s3181_s1 + $0x130] ss:$8 sps:$4 sm:$0xff]   ;;  %v2228_v11 = vld [vmem:[%s3181_s1 + $0x144] ss:$8 sps:$4 sm:$0xff]   ;;  %v2279_v12 = vld [vmem:[%s3181_s1 + $0x2e0] ss:$8 sps:$4 sm:$0xff]  }
  0x1f   : > { %439 = vmatpush1.bf16.msra.mxu0 %v2168_v14  ;;  %v2283_v13 = vld [vmem:[%s3181_s1 + $0x2f4] ss:$8 sps:$4 sm:$0xff]   ;;  %v2226_v14 = vld [vmem:[%s3181_s1 + $0x140] ss:$8 sps:$4 sm:$0xff]   ;;  %v2285_v16 = vld [vmem:[%s3181_s1 + $0x2f0] ss:$8 sps:$4 sm:$0xff]  }
  0x20   : > { %440 = vmatprep.subr.bf16.mxu0 %v2169_v18  ;;  %v2234_v15 = vld [vmem:[%s3181_s1 + $0x154] ss:$8 sps:$4 sm:$0xff]   ;;  %v2232_v17 = vld [vmem:[%s3181_s1 + $0x150] ss:$8 sps:$4 sm:$0xff]   ;;  %v2240_v18 = vld [vmem:[%s3181_s1 + $0x164] ss:$8 sps:$4 sm:$0xff]  }
  0x21   : > { %706 = vmatpush1.bf16.msra.mxu1 %v2225_v37  ;;  %v2246_v20 = vld [vmem:[%s3181_s1 + $0x174] ss:$8 sps:$4 sm:$0xff]   ;;  %v2244_v21 = vld [vmem:[%s3181_s1 + $0x170] ss:$8 sps:$4 sm:$0xff]   ;;  %v2264_v26 = vld [vmem:[%s3181_s1 + $0x1a4] ss:$8 sps:$4 sm:$0xff]  }
  0x22   : > { %707 = vmatprep.subr.bf16.mxu1 %v2229_v38  ;;  %v2258_v24 = vld [vmem:[%s3181_s1 + $0x194] ss:$8 sps:$4 sm:$0xff]   ;;  %v2256_v25 = vld [vmem:[%s3181_s1 + $0x190] ss:$8 sps:$4 sm:$0xff]   ;;  %v2276_v30 = vld [vmem:[%s3181_s1 + $0x1c4] ss:$8 sps:$4 sm:$0xff]  }
  0x23   : > { %441 = vmatpush1.bf16.msra.mxu0 %v2171_v22  ;;  %v2252_v22 = vld [vmem:[%s3181_s1 + $0x184] ss:$8 sps:$4 sm:$0xff]   ;;  %v2268_v29 = vld [vmem:[%s3181_s1 + $0x1b0] ss:$8 sps:$4 sm:$0xff]   ;;  %v2292_v38 = vld [vmem:[%s3183_s3] ss:$8 sps:$4 sm:$0xff]  }
  0x24   : > { %442 = vmatprep.subr.bf16.mxu0 %v2172_v23  ;;  %v2250_v23 = vld [vmem:[%s3181_s1 + $0x180] ss:$8 sps:$4 sm:$0xff]   ;;  %v2280_v33 = vld [vmem:[%s3181_s1 + $0x1d0] ss:$8 sps:$4 sm:$0xff]   ;;  %v2288_v34 = vld [vmem:[%s3181_s1 + $0x1e4] ss:$8 sps:$4 sm:$0xff]  }
  0x25   : > { %708 = vmatpush1.bf16.msra.mxu1 %v2231_v41  ;;  %v2289_v37 = vld [vmem:[%s3181_s1 + $0x1f0] ss:$8 sps:$4 sm:$0xff]   ;;  %v2297_v41 = vld [vmem:[%s3183_s3 + $0x204] ss:$8 sps:$4 sm:$0xff]  }
  0x26   : > { %709 = vmatprep.subr.bf16.mxu1 %v2235_v42  ;;  %v2300_v42 = vld [vmem:[%s3183_s3 + $0x14] ss:$8 sps:$4 sm:$0xff]  }
  0x27   : > { %443 = vmatpush1.bf16.msra.mxu0 %v2174_v27  ;;  %v2262_v27 = vld [vmem:[%s3181_s1 + $0x1a0] ss:$8 sps:$4 sm:$0xff]  }
  0x28   : > { %444 = vmatprep.subr.bf16.mxu0 %v2175_v28  ;;  %v2270_v28 = vld [vmem:[%s3181_s1 + $0x1b4] ss:$8 sps:$4 sm:$0xff]  }
  0x29   : > { %710 = vmatpush1.bf16.msra.mxu1 %v2237_v45  ;;  %v2301_v45 = vld [vmem:[%s3183_s3 + $0x210] ss:$8 sps:$4 sm:$0xff]  }
  0x2a   : > { %711 = vmatprep.subr.bf16.mxu1 %v2241_v46  ;;  %v2306_v46 = vld [vmem:[%s3183_s3 + $0x24] ss:$8 sps:$4 sm:$0xff]  }
  0x2b   : > { %445 = vmatpush1.bf16.msra.mxu0 %v2177_v31  ;;  %v2274_v31 = vld [vmem:[%s3181_s1 + $0x1c0] ss:$8 sps:$4 sm:$0xff]  }
  0x2c   : > { %446 = vmatprep.subr.bf16.mxu0 %v2178_v32  ;;  %v2282_v32 = vld [vmem:[%s3181_s1 + $0x1d4] ss:$8 sps:$4 sm:$0xff]  }
  0x2d   : > { %712 = vmatpush1.bf16.msra.mxu1 %v2243_v49  ;;  %v2307_v49 = vld [vmem:[%s3183_s3 + $0x220] ss:$8 sps:$4 sm:$0xff]  }
  0x2e   : > { %713 = vmatprep.subr.bf16.mxu1 %v2247_v50  ;;  %v2312_v50 = vld [vmem:[%s3183_s3 + $0x34] ss:$8 sps:$4 sm:$0xff]  }
  0x2f   : > { %447 = vmatpush1.bf16.msra.mxu0 %v2180_v35  ;;  %v2286_v35 = vld [vmem:[%s3181_s1 + $0x1e0] ss:$8 sps:$4 sm:$0xff]  }
  0x30   : > { %448 = vmatprep.subr.bf16.mxu0 %v2181_v36  ;;  %v2291_v36 = vld [vmem:[%s3181_s1 + $0x1f4] ss:$8 sps:$4 sm:$0xff]  }
  0x31   : > { %714 = vmatpush1.bf16.msra.mxu1 %v2249_v53  ;;  %v2313_v53 = vld [vmem:[%s3183_s3 + $0x230] ss:$8 sps:$4 sm:$0xff]  }
  0x32   : > { %715 = vmatprep.subr.bf16.mxu1 %v2253_v54  ;;  %v2318_v54 = vld [vmem:[%s3183_s3 + $0x44] ss:$8 sps:$4 sm:$0xff]  }
  0x33   : > { %449 = vmatpush1.bf16.msra.mxu0 %v2183_v39  ;;  %v2294_v39 = vld [vmem:[%s3183_s3 + $0x4] ss:$8 sps:$4 sm:$0xff]  }
  0x34   : > { %450 = vmatprep.subr.bf16.mxu0 %v2184_v40  ;;  %v2295_v40 = vld [vmem:[%s3183_s3 + $0x200] ss:$8 sps:$4 sm:$0xff]  }
  0x35   : > { %716 = vmatpush1.bf16.msra.mxu1 %v2255_v59  ;;  %v2319_v59 = vld [vmem:[%s3183_s3 + $0x240] ss:$8 sps:$4 sm:$0xff]  }
  0x36   : > { %717 = vmatprep.subr.bf16.mxu1 %v2259_v60  ;;  %v2324_v60 = vld [vmem:[%s3183_s3 + $0x54] ss:$8 sps:$4 sm:$0xff]  }
  0x37   : > { %451 = vmatpush1.bf16.msra.mxu0 %v2186_v43  ;;  %v2303_v43 = vld [vmem:[%s3183_s3 + $0x214] ss:$8 sps:$4 sm:$0xff]  }
  0x38   : > { %452 = vmatprep.subr.bf16.mxu0 %v2187_v44  ;;  %v2298_v44 = vld [vmem:[%s3183_s3 + $0x10] ss:$8 sps:$4 sm:$0xff]  }
  0x39   : > { %718 = vmatpush1.bf16.msra.mxu1 %v2261_v0  ;;  %v2330_v0 = vld [vmem:[%s3183_s3 + $0x64] ss:$8 sps:$4 sm:$0xff]  }
  0x3a   : > { %719 = vmatprep.subr.bf16.mxu1 %v2265_v2  ;;  %v2328_v2 = vld [vmem:[%s3183_s3 + $0x60] ss:$8 sps:$4 sm:$0xff]  }
  0x3b   : > { %453 = vmatpush1.bf16.msra.mxu0 %v2189_v47  ;;  %v2309_v47 = vld [vmem:[%s3183_s3 + $0x224] ss:$8 sps:$4 sm:$0xff]  }
  0x3c   : > { %454 = vmatprep.subr.bf16.mxu0 %v2190_v48  ;;  %v2304_v48 = vld [vmem:[%s3183_s3 + $0x20] ss:$8 sps:$4 sm:$0xff]  }
  0x3d   : > { %720 = vmatpush1.bf16.msra.mxu1 %v2267_v4  ;;  %v2336_v4 = vld [vmem:[%s3183_s3 + $0x74] ss:$8 sps:$4 sm:$0xff]  }
  0x3e   : > { %721 = vmatprep.subr.bf16.mxu1 %v2271_v5  ;;  %v2339_v5 = vld [vmem:[%s3183_s3 + $0x274] ss:$8 sps:$4 sm:$0xff]  }
  0x3f   : > { %455 = vmatpush1.bf16.msra.mxu0 %v2192_v51  ;;  %v2315_v51 = vld [vmem:[%s3183_s3 + $0x234] ss:$8 sps:$4 sm:$0xff]  }
  0x40   : > { %456 = vmatprep.subr.bf16.mxu0 %v2195_v52  ;;  %v2310_v52 = vld [vmem:[%s3183_s3 + $0x30] ss:$8 sps:$4 sm:$0xff]  }
  0x41   : > { %722 = vmatpush1.bf16.msra.mxu1 %v2273_v8  ;;  %v2342_v8 = vld [vmem:[%s3183_s3 + $0x84] ss:$8 sps:$4 sm:$0xff]  }
  0x42   : > { %723 = vmatprep.subr.bf16.mxu1 %v2277_v9  ;;  %v2345_v9 = vld [vmem:[%s3183_s3 + $0x284] ss:$8 sps:$4 sm:$0xff]  }
  0x43   : > { %457 = vmatpush1.bf16.msra.mxu0 %v2198_v55  ;;  %v2321_v55 = vld [vmem:[%s3183_s3 + $0x244] ss:$8 sps:$4 sm:$0xff]  }
  0x44   : > { %928 = vmatprep.subr.bf16.mxu0 %v2204_v58  ;;  %v2316_v58 = vld [vmem:[%s3183_s3 + $0x40] ss:$8 sps:$4 sm:$0xff]  }
  0x45   : > { %724 = vmatpush1.bf16.msra.mxu1 %v2279_v12  ;;  %v2348_v12 = vld [vmem:[%s3183_s3 + $0x94] ss:$8 sps:$4 sm:$0xff]  }
  0x46   : > { %459 = vmatmul.mubr.bf16.vlgmr.msra.gmra.mrb[0].mxu0 %v2676_v61  ;;  %725 = vmatprep.subr.bf16.mxu1 %v2283_v13  ;;  %v2351_v13 = vld [vmem:[%s3183_s3 + $0x294] ss:$8 sps:$4 sm:$0xff]  }
  0x47   : > { %929 = vmatpush1.bf16.msra.mxu0 %v2202_v62  ;;  %960 = vmatprep.mubr.bf16.mxu0 %v2547_v19  ;;  %v2238_v19 = vld [vmem:[%s3181_s1 + $0x160] ss:$8 sps:$4 sm:$0xff]   ;;  %v2322_v62 = vld [vmem:[%s3183_s3 + $0x50] ss:$8 sps:$4 sm:$0xff]  }
  0x48   : > { %930 = vmatprep.subr.bf16.mxu0 %v2210_v63  ;;  %v2325_v63 = vld [vmem:[%s3183_s3 + $0x250] ss:$8 sps:$4 sm:$0xff]  }
  0x49   : > { %726 = vmatpush1.bf16.msra.mxu1 %v2285_v16  ;;  %v2354_v16 = vld [vmem:[%s3183_s3 + $0xa4] ss:$8 sps:$4 sm:$0xff]  }
  0x4a   : > { %1185 = vmatprep.subr.bf16.mxu1 %v2294_v39  ;;  %v2385_v39 = vld [vmem:[%s3183_s3 + $0x2f0] ss:$8 sps:$4 sm:$0xff]  }
  0x4b   : > { %931 = vmatpush1.bf16.msra.mxu0 %v2208_v1  ;;  %v2333_v1 = vld [vmem:[%s3183_s3 + $0x264] ss:$8 sps:$4 sm:$0xff]  }
  0x4c   : > { %932 = vmatprep.subr.bf16.mxu0 %v2216_v3  ;;  %728 = vmatmul.mubr.bf16.vlgmr.msra.gmra.mrb[0].mxu1 %v2676_v61  ;;  %v2331_v3 = vld [vmem:[%s3183_s3 + $0x260] ss:$8 sps:$4 sm:$0xff]  }
  0x4d   : > { %1186 = vmatpush1.bf16.msra.mxu1 %v2292_v38  ;;  %v2387_v38 = vld [vmem:[%s3183_s3 + $0x2f4] ss:$8 sps:$4 sm:$0xff]  }
  0x4e   : > { %1187 = vmatprep.subr.bf16.mxu1 %v2300_v42 }
  0x4f   : > { %933 = vmatpush1.bf16.msra.mxu0 %v2214_v6  ;;  %v2334_v6 = vld [vmem:[%s3183_s3 + $0x70] ss:$8 sps:$4 sm:$0xff]  }
  0x50   : > { %934 = vmatprep.subr.bf16.mxu0 %v2222_v7  ;;  %v2337_v7 = vld [vmem:[%s3183_s3 + $0x270] ss:$8 sps:$4 sm:$0xff]  }
  0x51   : > { %1188 = vmatpush1.bf16.msra.mxu1 %v2298_v44 }
  0x52   : > { %1189 = vmatprep.subr.bf16.mxu1 %v2306_v46 }
  0x53   : > { %935 = vmatpush1.bf16.msra.mxu0 %v2220_v10  ;;  %v2340_v10 = vld [vmem:[%s3183_s3 + $0x80] ss:$8 sps:$4 sm:$0xff]  }
  0x54   : > { %936 = vmatprep.subr.bf16.mxu0 %v2228_v11  ;;  %v2343_v11 = vld [vmem:[%s3183_s3 + $0x280] ss:$8 sps:$4 sm:$0xff]  }
  0x55   : > { %1190 = vmatpush1.bf16.msra.mxu1 %v2304_v48 }
  0x56   : > { %1191 = vmatprep.subr.bf16.mxu1 %v2312_v50 }
  0x57   : > { %937 = vmatpush1.bf16.msra.mxu0 %v2226_v14  ;;  %v2346_v14 = vld [vmem:[%s3183_s3 + $0x90] ss:$8 sps:$4 sm:$0xff]  }
  0x58   : > { %938 = vmatprep.subr.bf16.mxu0 %v2234_v15  ;;  %v2349_v15 = vld [vmem:[%s3183_s3 + $0x290] ss:$8 sps:$4 sm:$0xff]  }
  0x59   : > { %1192 = vmatpush1.bf16.msra.mxu1 %v2310_v52 }
  0x5a   : > { %1193 = vmatprep.subr.bf16.mxu1 %v2318_v54 }
  0x5b   : > { %939 = vmatpush1.bf16.msra.mxu0 %v2232_v17  ;;  %v2357_v17 = vld [vmem:[%s3183_s3 + $0x2a4] ss:$8 sps:$4 sm:$0xff]  }
  0x5c   : > { %940 = vmatprep.subr.bf16.mxu0 %v2240_v18  ;;  %v2352_v18 = vld [vmem:[%s3183_s3 + $0xa0] ss:$8 sps:$4 sm:$0xff]  }
  0x5d   : > { %1194 = vmatpush1.bf16.msra.mxu1 %v2316_v58 }
  0x5e   : > { %1195 = vmatprep.subr.bf16.mxu1 %v2324_v60 }
  0x5f   : > { %941 = vmatpush1.bf16.msra.mxu0 %v2238_v19  ;;  %v2355_v19 = vld [vmem:[%s3183_s3 + $0x2a0] ss:$8 sps:$4 sm:$0xff]  }
  0x60   : > { %942 = vmatprep.subr.bf16.mxu0 %v2246_v20  ;;  %v2360_v20 = vld [vmem:[%s3183_s3 + $0xb4] ss:$8 sps:$4 sm:$0xff]  }
  0x61   : > { %1196 = vmatpush1.bf16.msra.mxu1 %v2322_v62 }
  0x62   : > { %1197 = vmatprep.subr.bf16.mxu1 %v2330_v0 }
  0x63   : > { %943 = vmatpush1.bf16.msra.mxu0 %v2244_v21  ;;  %v2363_v21 = vld [vmem:[%s3183_s3 + $0x2b4] ss:$8 sps:$4 sm:$0xff]  }
  0x64   : > { %944 = vmatprep.subr.bf16.mxu0 %v2252_v22  ;;  %v2358_v22 = vld [vmem:[%s3183_s3 + $0xb0] ss:$8 sps:$4 sm:$0xff]  }
  0x65   : > { %1198 = vmatpush1.bf16.msra.mxu1 %v2328_v2 }
  0x66   : > { %1199 = vmatprep.subr.bf16.mxu1 %v2336_v4 }
  0x67   : > { %945 = vmatpush1.bf16.msra.mxu0 %v2250_v23  ;;  %v2361_v23 = vld [vmem:[%s3183_s3 + $0x2b0] ss:$8 sps:$4 sm:$0xff]  }
  0x68   : > { %946 = vmatprep.subr.bf16.mxu0 %v2258_v24  ;;  %v2366_v24 = vld [vmem:[%s3183_s3 + $0xc4] ss:$8 sps:$4 sm:$0xff]  }
  0x69   : > { %1200 = vmatpush1.bf16.msra.mxu1 %v2334_v6 }
  0x6a   : > { %1201 = vmatprep.subr.bf16.mxu1 %v2342_v8 }
  0x6b   : > { %947 = vmatpush1.bf16.msra.mxu0 %v2256_v25  ;;  %v2369_v25 = vld [vmem:[%s3183_s3 + $0x2c4] ss:$8 sps:$4 sm:$0xff]  }
  0x6c   : > { %948 = vmatprep.subr.bf16.mxu0 %v2264_v26  ;;  %v2364_v26 = vld [vmem:[%s3183_s3 + $0xc0] ss:$8 sps:$4 sm:$0xff]  }
  0x6d   : > { %1202 = vmatpush1.bf16.msra.mxu1 %v2340_v10 }
  0x6e   : > { %1203 = vmatprep.subr.bf16.mxu1 %v2348_v12 }
  0x6f   : > { %949 = vmatpush1.bf16.msra.mxu0 %v2262_v27  ;;  %v2367_v27 = vld [vmem:[%s3183_s3 + $0x2c0] ss:$8 sps:$4 sm:$0xff]  }
  0x70   : > { %950 = vmatprep.subr.bf16.mxu0 %v2270_v28  ;;  %v2372_v28 = vld [vmem:[%s3183_s3 + $0xd4] ss:$8 sps:$4 sm:$0xff]  }
  0x71   : > { %1204 = vmatpush1.bf16.msra.mxu1 %v2346_v14 }
  0x72   : > { %1205 = vmatprep.subr.bf16.mxu1 %v2354_v16 }
  0x73   : > { %951 = vmatpush1.bf16.msra.mxu0 %v2268_v29  ;;  %v2370_v29 = vld [vmem:[%s3183_s3 + $0xd0] ss:$8 sps:$4 sm:$0xff]  }
  0x74   : > { %952 = vmatprep.subr.bf16.mxu0 %v2276_v30  ;;  %v2375_v30 = vld [vmem:[%s3183_s3 + $0x2d4] ss:$8 sps:$4 sm:$0xff]  }
  0x75   : > { %1206 = vmatpush1.bf16.msra.mxu1 %v2352_v18 }
  0x76   : > { %1207 = vmatprep.subr.bf16.mxu1 %v2360_v20 }
  0x77   : > { %953 = vmatpush1.bf16.msra.mxu0 %v2274_v31  ;;  %v2373_v31 = vld [vmem:[%s3183_s3 + $0x2d0] ss:$8 sps:$4 sm:$0xff]  }
  0x78   : > { %954 = vmatprep.subr.bf16.mxu0 %v2282_v32  ;;  %v2378_v32 = vld [vmem:[%s3183_s3 + $0xe4] ss:$8 sps:$4 sm:$0xff]  }
  0x79   : > { %1208 = vmatpush1.bf16.msra.mxu1 %v2358_v22 }
  0x7a   : > { %1209 = vmatprep.subr.bf16.mxu1 %v2366_v24 }
  0x7b   : > { %955 = vmatpush1.bf16.msra.mxu0 %v2280_v33  ;;  %v2376_v33 = vld [vmem:[%s3183_s3 + $0xe0] ss:$8 sps:$4 sm:$0xff]  }
  0x7c   : > { %956 = vmatprep.subr.bf16.mxu0 %v2288_v34  ;;  %v2381_v34 = vld [vmem:[%s3183_s3 + $0x2e4] ss:$8 sps:$4 sm:$0xff]  }
  0x7d   : > { %1210 = vmatpush1.bf16.msra.mxu1 %v2364_v26 }
  0x7e   : > { %1211 = vmatprep.subr.bf16.mxu1 %v2372_v28 }
  0x7f   : > { %957 = vmatpush1.bf16.msra.mxu0 %v2286_v35  ;;  %v2379_v35 = vld [vmem:[%s3183_s3 + $0x2e0] ss:$8 sps:$4 sm:$0xff]  }
  0x80   : > { %958 = vmatprep.subr.bf16.mxu0 %v2291_v36  ;;  %v2384_v36 = vld [vmem:[%s3183_s3 + $0xf4] ss:$8 sps:$4 sm:$0xff]  }
  0x81   : > { %1212 = vmatpush1.bf16.msra.mxu1 %v2370_v29 }
  0x82   : > { %1213 = vmatprep.subr.bf16.mxu1 %v2378_v32 }
  0x83   : > { %959 = vmatpush1.bf16.msra.mxu0 %v2289_v37  ;;  %v2382_v37 = vld [vmem:[%s3183_s3 + $0xf0] ss:$8 sps:$4 sm:$0xff]  }
  0x84   : > { %1454 = vmatprep.subr.bf16.mxu0 %v2297_v41  ;;  %v229_v41 = vlaneseq }
  0x85   : > { %1214 = vmatpush1.bf16.msra.mxu1 %v2376_v33  ;;  %v2388_v33 = vld [vmem:[%s3183_s3 + $0x100] ss:$8 sps:$4 sm:$0xff]  }
  0x86   : > { %961 = vmatmul.mubr.bf16.vlgmr.msra.gmra.mrb[4].mxu0 %v2676_v61  ;;  %v2327_v61 = vld [vmem:[%s3183_s3 + $0x254] ss:$8 sps:$4 sm:$0xff]   ;;  %1215 = vmatprep.subr.bf16.mxu1 %v2384_v36  ;;  %v2997_v42 = vshrl.u32 %v229_v41, 7  ;;  %v2396_v36 = vld [vmem:[%s3183_s3 + $0x124] ss:$8 sps:$4 sm:$0xff]  }
  0x87   : > { %1455 = vmatpush1.bf16.msra.mxu0 %v2295_v40  ;;  %v2390_v40 = vld [vmem:[%s3183_s3 + $0x104] ss:$8 sps:$4 sm:$0xff]   ;;  %v2400_v41 = vld [vmem:[%s3183_s3 + $0x140] ss:$8 sps:$4 sm:$0xff]  }
  0x88   : > { %1456 = vmatprep.subr.bf16.mxu0 %v2303_v43  ;;  %vm744_vm0 = vcmp.lt.s32.totalorder %v2997_v42, 1  ;;  %vm759_vm1 = vcmp.lt.s32.totalorder %v2997_v42, 7  ;;  %vm738_vm2 = vcmp.gt.s32.totalorder %v2997_v42, 0  ;;  %v979_v6 = vsub.s32 0, %v2997_v42 }
  0x89   : > { %1216 = vmatpush1.bf16.msra.mxu1 %v2382_v37  ;;  %v983_v10 = vsub.s32 1, %v2997_v42  ;;  %v2394_v37 = vld [vmem:[%s3183_s3 + $0x120] ss:$8 sps:$4 sm:$0xff]  }
  0x8a   : > { %1681 = vmatprep.subr.bf16.mxu1 %v2390_v40  ;;  %v2402_v40 = vld [vmem:[%s3183_s3 + $0x144] ss:$8 sps:$4 sm:$0xff]  }
  0x8b   : > { %1457 = vmatpush1.bf16.msra.mxu0 %v2301_v45 }
  0x8c   : > { %1458 = vmatprep.subr.bf16.mxu0 %v2309_v47 }
  0x8f   : > { %1459 = vmatpush1.bf16.msra.mxu0 %v2307_v49 }
  0x90   : > { %1460 = vmatprep.subr.bf16.mxu0 %v2315_v51 }
  0x93   : > { %1461 = vmatpush1.bf16.msra.mxu0 %v2313_v53 }
  0x94   : > { %1462 = vmatprep.subr.bf16.mxu0 %v2321_v55 }
  0x97   : > { %1463 = vmatpush1.bf16.msra.mxu0 %v2319_v59 }
  0x98   : > { %1464 = vmatprep.subr.bf16.mxu0 %v2327_v61 }
  0x9b   : > { %1465 = vmatpush1.bf16.msra.mxu0 %v2325_v63 }
  0x9c   : > { %1466 = vmatprep.subr.bf16.mxu0 %v2333_v1 }
  0x9f   : > { %1467 = vmatpush1.bf16.msra.mxu0 %v2331_v3 }
  0xa0   : > { %1468 = vmatprep.subr.bf16.mxu0 %v2339_v5  ;;  %v3019_v5 = vadd.s32 8, %v2997_v42 }
  0xa2   : > { %vm754_vm3 = vcmp.lt.s32.totalorder %v3019_v5, 15 }
  0xa3   : > { %1469 = vmatpush1.bf16.msra.mxu0 %v2337_v7 }
  0xa4   : > { %1470 = vmatprep.subr.bf16.mxu0 %v2345_v9  ;;  %v975_v9 = vld [vmem:[%s3182_s2] sm:$0x3] }
  0xa7   : > { %1471 = vmatpush1.bf16.msra.mxu0 %v2343_v11 }
  0xa8   : > { %1472 = vmatprep.subr.bf16.mxu0 %v2351_v13 }
  0xab   : > { %1473 = vmatpush1.bf16.msra.mxu0 %v2349_v15 }
  0xac   : > { %1474 = vmatprep.subr.bf16.mxu0 %v2357_v17  ;;  %v980_v17 = vrot.slane %v975_v9, %v979_v6 }
  0xaf   : > { %1475 = vmatpush1.bf16.msra.mxu0 %v2355_v19 }
  0xb0   : > { %1476 = vmatprep.subr.bf16.mxu0 %v2363_v21  ;;  %v984_v21 = vrot.slane %v975_v9, %v983_v10 }
  0xb3   : > { %1477 = vmatpush1.bf16.msra.mxu0 %v2361_v23 }
  0xb4   : > { %1478 = vmatprep.subr.bf16.mxu0 %v2369_v25 }
  0xb7   : > { %1479 = vmatpush1.bf16.msra.mxu0 %v2367_v27 }
  0xb8   : > { %1480 = vmatprep.subr.bf16.mxu0 %v2375_v30 }
  0xbb   : > { %1481 = vmatpush1.bf16.msra.mxu0 %v2373_v31 }
  0xbc   : > { %1482 = vmatprep.subr.bf16.mxu0 %v2381_v34  ;;  %v2393_v34 = vld [vmem:[%s3183_s3 + $0x114] ss:$8 sps:$4 sm:$0xff]  }
  0xbf   : > { %1483 = vmatpush1.bf16.msra.mxu0 %v2379_v35  ;;  %v2391_v35 = vld [vmem:[%s3183_s3 + $0x110] ss:$8 sps:$4 sm:$0xff]  }
  0xc0   : > { %1484 = vmatprep.subr.bf16.mxu0 %v2387_v38  ;;  %v2399_v38 = vld [vmem:[%s3183_s3 + $0x134] ss:$8 sps:$4 sm:$0xff]  }
  0xc3   : > { %1485 = vmatpush1.bf16.msra.mxu0 %v2385_v39  ;;  %v2397_v39 = vld [vmem:[%s3183_s3 + $0x130] ss:$8 sps:$4 sm:$0xff]  }
 0x119   : > { %v460_v43 = vpop.f32.mrb[0].mxu0 }
 0x11a   : > { %v740_v44 = vrot.slane %v460_v43, 7  ;;  %v462_v45 = vpop.f32.mrb[1].mxu0  ;;  %v2405_v43 = vld [vmem:[%s3183_s3 + $0x154] ss:$8 sps:$4 sm:$0xff]  }
 0x11b   : > { %v464_v46 = vpop.f32.mrb[2].mxu0  ;;  %v741_v49 = vrot.slane %v462_v45, 7  ;;  %v2408_v45 = vld [vmem:[%s3183_s3 + $0x164] ss:$8 sps:$4 sm:$0xff]  }
 0x11c   : > { %v742_v47 = vrot.slane %v464_v46, 7  ;;  %v466_v48 = vpop.f32.mrb[3].mxu0  ;;  %v2406_v46 = vld [vmem:[%s3183_s3 + $0x160] ss:$8 sps:$4 sm:$0xff]  }
 0x11d   : > { %v743_v50 = vrot.slane %v466_v48, 7  ;;  %v2409_v48 = vld [vmem:[%s3183_s3 + $0x170] ss:$8 sps:$4 sm:$0xff]  }
 0x11e   : > { %v747_v51 = vsel %vm744_vm0, %v742_v47, %v740_v44  ;;  %v745_v52 = vsel %vm744_vm0, %v740_v44, %v742_v47  ;;  %v2403_v44 = vld [vmem:[%s3183_s3 + $0x150] ss:$8 sps:$4 sm:$0xff]   ;;  %v2411_v47 = vld [vmem:[%s3183_s3 + $0x174] ss:$8 sps:$4 sm:$0xff]  }
 0x11f   : > { %v748_v53 = vsel %vm744_vm0, %v743_v50, %v741_v49  ;;  %v746_v54 = vsel %vm744_vm0, %v741_v49, %v743_v50  ;;  %v729_v55 = vpop.f32.mrb[0].mxu1  ;;  %v749_v7 = vsel %vm738_vm2, %v747_v51, 0.0  ;;  %v2414_v49 = vld [vmem:[%s3183_s3 + $0x184] ss:$8 sps:$4 sm:$0xff]   ;;  %v2412_v50 = vld [vmem:[%s3183_s3 + $0x180] ss:$8 sps:$4 sm:$0xff]  }
 0x120   : > { %v755_v58 = vrot.slane %v729_v55, 1  ;;  %v731_v59 = vpop.f32.mrb[1].mxu1  ;;  %v750_v12 = vsel %vm738_vm2, %v748_v53, 0.0  ;;  %v2417_v51 = vld [vmem:[%s3183_s3 + $0x194] ss:$8 sps:$4 sm:$0xff]  }
 0x121   : > { %v756_v60 = vrot.slane %v731_v59, 1  ;;  %v733_v61 = vpop.f32.mrb[2].mxu1  ;;  %v2420_v53 = vld [vmem:[%s3183_s3 + $0x1a4] ss:$8 sps:$4 sm:$0xff]   ;;  %v2423_v55 = vld [vmem:[%s3183_s3 + $0x1b4] ss:$8 sps:$4 sm:$0xff]  }
 0x122   : > { %v757_v62 = vrot.slane %v733_v61, 1  ;;  %v735_v63 = vpop.f32.mrb[3].mxu1  ;;  %v2426_v59 = vld [vmem:[%s3183_s3 + $0x1c4] ss:$8 sps:$4 sm:$0xff]   ;;  %v2429_v61 = vld [vmem:[%s3183_s3 + $0x1d4] ss:$8 sps:$4 sm:$0xff]  }
 0x123   : > { %v758_v0 = vrot.slane %v735_v63, 1  ;;  %v2432_v63 = vld [vmem:[%s3183_s3 + $0x1e4] ss:$8 sps:$4 sm:$0xff]  }
 0x124   : > { %v760_v1 = vsel %vm759_vm1, %v755_v58, %v757_v62  ;;  %v762_v2 = vsel %vm759_vm1, %v757_v62, %v755_v58  ;;  %v2421_v58 = vld [vmem:[%s3183_s3 + $0x1b0] ss:$8 sps:$4 sm:$0xff]  }
 0x125   : > { %v761_v3 = vsel %vm759_vm1, %v756_v60, %v758_v0  ;;  %v763_v4 = vsel %vm759_vm1, %v758_v0, %v756_v60  ;;  %v766_v22 = vsel %vm754_vm3, %v762_v2, 0.0  ;;  %v2424_v60 = vld [vmem:[%s3183_s3 + $0x1c0] ss:$8 sps:$4 sm:$0xff]   ;;  %v2427_v62 = vld [vmem:[%s3183_s3 + $0x1d0] ss:$8 sps:$4 sm:$0xff]  }
 0x126   : > { %v767_v25 = vsel %vm754_vm3, %v763_v4, 0.0  ;;  %v2430_v0 = vld [vmem:[%s3183_s3 + $0x1e0] ss:$8 sps:$4 sm:$0xff]   ;;  %v2433_v2 = vld [vmem:[%s3183_s3 + $0x1f0] ss:$8 sps:$4 sm:$0xff]  }
 0x159   : > { %v962_v8 = vpop.f32.mrb[4].mxu0 }
 0x15a   : > { %v963_v11 = vadd.f32 %v962_v8, %v749_v7  ;;  %v964_v13 = vpop.f32.mrb[5].mxu0 }
 0x15b   : > { %v965_v14 = vadd.f32 %v964_v13, %v750_v12  ;;  %v966_v15 = vpop.f32.mrb[6].mxu0 }
 0x15c   : > { %v971_v16 = vadd.f32 %v963_v11, %v760_v1  ;;  %v967_v18 = vadd.f32 %v966_v15, %v745_v52  ;;  %v968_v19 = vpop.f32.mrb[7].mxu0  ;;  %v2415_v52 = vld [vmem:[%s3183_s3 + $0x190] ss:$8 sps:$4 sm:$0xff]   ;;  %v2435_v1 = vld [vmem:[%s3183_s3 + $0x1f4] ss:$8 sps:$4 sm:$0xff]  }
 0x15d   : > { %v972_v20 = vadd.f32 %v965_v14, %v761_v3  ;;  %v969_v23 = vadd.f32 %v968_v19, %v746_v54  ;;  %v2418_v54 = vld [vmem:[%s3183_s3 + $0x1a0] ss:$8 sps:$4 sm:$0xff]  }
 0x15e   : > { %v973_v24 = vadd.f32 %v967_v18, %v766_v22  ;;  %v987_v27 = vadd.f32 %v980_v17, %v971_v16 }
 0x15f   : > { %v974_v26 = vadd.f32 %v969_v23, %v767_v25  ;;  %v988_v29 = vadd.f32 %v984_v21, %v972_v20 }
 0x160   : > { %v989_v28 = vadd.f32 %v980_v17, %v973_v24 }
 0x161   : > { %v990_v30 = vadd.f32 %v984_v21, %v974_v26 }
 0x162   : > { %v3039_v31 = vpack.c.bf16 %v989_v28, %v987_v27 }
 0x163   : > { %v992_v32 = vpack.c.bf16 %v990_v30, %v988_v29  ;;  %v1728_v30 = vld [vmem:[%s3184_s4] sm:$0x3] }
 0x165   : > { %1217 = vmatprep.mubr.bf16.mxu1 %v992_v32  ;;  %1486 = vmatprep.mubr.bf16.mxu0 %v992_v32 }
 0x166   : > { %1218 = vmatmul.mubr.bf16.vlgmr.msra.gmra.mrb[4].mxu1 %v3039_v31  ;;  %1487 = vmatmul.mubr.bf16.vlgmr.msra.gmra.mrb[8].mxu0 %v3039_v31 }
 0x167   : > { %1682 = vmatpush1.bf16.msra.mxu1 %v2388_v33  ;;  %1713 = vmatprep.mubr.bf16.mxu1 %v992_v32 }
 0x168   : > { %1683 = vmatprep.subr.bf16.mxu1 %v2393_v34  ;;  %v1733_v34 = vrot.slane %v1728_v30, %v979_v6 }
 0x16b   : > { %1684 = vmatpush1.bf16.msra.mxu1 %v2391_v35 }
 0x16c   : > { %1685 = vmatprep.subr.bf16.mxu1 %v2396_v36 }
 0x16f   : > { %1686 = vmatpush1.bf16.msra.mxu1 %v2394_v37 }
 0x170   : > { %1687 = vmatprep.subr.bf16.mxu1 %v2399_v38  ;;  %v1737_v38 = vrot.slane %v1728_v30, %v983_v10 }
 0x173   : > { %1688 = vmatpush1.bf16.msra.mxu1 %v2397_v39 }
 0x174   : > { %1689 = vmatprep.subr.bf16.mxu1 %v2402_v40 }
 0x177   : > { %1690 = vmatpush1.bf16.msra.mxu1 %v2400_v41 }
 0x178   : > { %1691 = vmatprep.subr.bf16.mxu1 %v2405_v43 }
 0x17b   : > { %1692 = vmatpush1.bf16.msra.mxu1 %v2403_v44 }
 0x17c   : > { %1693 = vmatprep.subr.bf16.mxu1 %v2408_v45 }
 0x17f   : > { %1694 = vmatpush1.bf16.msra.mxu1 %v2406_v46 }
 0x180   : > { %1695 = vmatprep.subr.bf16.mxu1 %v2411_v47 }
 0x183   : > { %1696 = vmatpush1.bf16.msra.mxu1 %v2409_v48 }
 0x184   : > { %1697 = vmatprep.subr.bf16.mxu1 %v2414_v49 }
 0x187   : > { %1698 = vmatpush1.bf16.msra.mxu1 %v2412_v50 }
 0x188   : > { %1699 = vmatprep.subr.bf16.mxu1 %v2417_v51  ;;  %v2436_v51 = vld [vmem:[%s2531_s26 + $0x8] sm:$0xff] }
 0x18b   : > { %1700 = vmatpush1.bf16.msra.mxu1 %v2415_v52 }
 0x18c   : > { %1701 = vmatprep.subr.bf16.mxu1 %v2420_v53 }
 0x18f   : > { %1702 = vmatpush1.bf16.msra.mxu1 %v2418_v54 }
 0x190   : > { %1703 = vmatprep.subr.bf16.mxu1 %v2423_v55  ;;  %v2437_v55 = vld [vmem:[%s2531_s26 + $0x18] sm:$0xff] }
 0x193   : > { %1704 = vmatpush1.bf16.msra.mxu1 %v2421_v58 }
 0x194   : > { %1705 = vmatprep.subr.bf16.mxu1 %v2426_v59 }
 0x197   : > { %1706 = vmatpush1.bf16.msra.mxu1 %v2424_v60 }
 0x198   : > { %1707 = vmatprep.subr.bf16.mxu1 %v2429_v61 }
 0x19b   : > { %1708 = vmatpush1.bf16.msra.mxu1 %v2427_v62 }
 0x19c   : > { %1709 = vmatprep.subr.bf16.mxu1 %v2432_v63 }
 0x19f   : > { %1710 = vmatpush1.bf16.msra.mxu1 %v2430_v0 }
 0x1a0   : > { %1711 = vmatprep.subr.bf16.mxu1 %v2435_v1 }
 0x1a3   : > { %1712 = vmatpush1.bf16.msra.mxu1 %v2433_v2 }
 0x1a6   : > { %1714 = vmatmul.mubr.bf16.vlgmr.msra.gmra.mrb[8].mxu1 %v3039_v31 }
 0x239   : > { %v1219_v3 = vpop.f32.mrb[4].mxu1  ;;  %v1488_v4 = vpop.f32.mrb[8].mxu0 }
 0x23a   : > { %v1221_v7 = vpop.f32.mrb[5].mxu1  ;;  %v1490_v8 = vpop.f32.mrb[9].mxu0  ;;  %v1497_v12 = vrot.slane %v1219_v3, 7  ;;  %v1509_v13 = vrot.slane %v1488_v4, 1 }
 0x23b   : > { %v1223_v9 = vpop.f32.mrb[6].mxu1  ;;  %v1492_v11 = vpop.f32.mrb[10].mxu0  ;;  %v1498_v18 = vrot.slane %v1221_v7, 7  ;;  %v1510_v19 = vrot.slane %v1490_v8, 1 }
 0x23c   : > { %v1499_v14 = vrot.slane %v1223_v9, 7  ;;  %v1511_v15 = vrot.slane %v1492_v11, 1  ;;  %v1225_v16 = vpop.f32.mrb[7].mxu1  ;;  %v1494_v17 = vpop.f32.mrb[11].mxu0 }
 0x23d   : > { %v1500_v20 = vrot.slane %v1225_v16, 7  ;;  %v1512_v21 = vrot.slane %v1494_v17, 1 }
 0x23e   : > { %v1503_v22 = vsel %vm744_vm0, %v1499_v14, %v1497_v12  ;;  %v1513_v23 = vsel %vm759_vm1, %v1509_v13, %v1511_v15  ;;  %v1501_v24 = vsel %vm744_vm0, %v1497_v12, %v1499_v14  ;;  %v1515_v25 = vsel %vm759_vm1, %v1511_v15, %v1509_v13 }
 0x23f   : > { %v1516_v26 = vsel %vm759_vm1, %v1512_v21, %v1510_v19  ;;  %v1504_v27 = vsel %vm744_vm0, %v1500_v20, %v1498_v18  ;;  %v1514_v28 = vsel %vm759_vm1, %v1510_v19, %v1512_v21  ;;  %v1502_v29 = vsel %vm744_vm0, %v1498_v18, %v1500_v20 }
 0x240   : > { %v1505_v31 = vsel %vm738_vm2, %v1503_v22, 0.0  ;;  %v1506_v35 = vsel %vm738_vm2, %v1504_v27, 0.0  ;;  %v1519_v45 = vsel %vm754_vm3, %v1515_v25, 0.0  ;;  %v1520_v48 = vsel %vm754_vm3, %v1516_v26, 0.0 }
 0x279   : > { %v1715_v32 = vpop.f32.mrb[8].mxu1 }
 0x27a   : > { %v1716_v33 = vadd.f32 %v1715_v32, %v1505_v31  ;;  %v1717_v36 = vpop.f32.mrb[9].mxu1 }
 0x27b   : > { %v1718_v37 = vadd.f32 %v1717_v36, %v1506_v35  ;;  %v1719_v39 = vpop.f32.mrb[10].mxu1 }
 0x27c   : > { %v1724_v40 = vadd.f32 %v1716_v33, %v1513_v23  ;;  %v1720_v41 = vadd.f32 %v1719_v39, %v1501_v24  ;;  %v1721_v43 = vpop.f32.mrb[11].mxu1 }
 0x27d   : > { %v1725_v44 = vadd.f32 %v1718_v37, %v1514_v28  ;;  %v1722_v46 = vadd.f32 %v1721_v43, %v1502_v29 }
 0x27e   : > { %v1740_v6 = vadd.f32 %v1733_v34, %v1724_v40  ;;  %v1726_v47 = vadd.f32 %v1720_v41, %v1519_v45 }
 0x27f   : > { %v1741_v42 = vadd.f32 %v1737_v38, %v1725_v44  ;;  %v1727_v10 = vadd.f32 %v1722_v46, %v1520_v48 }
 0x280   : > { %v1744_v49 = vadd.f32 %v1740_v6, %v2660_v56  ;;  %v1742_v50 = vadd.f32 %v1733_v34, %v1726_v47 }
 0x281   : > { %v1745_v52 = vadd.f32 %v2436_v51, %v1741_v42  ;;  %v1743_v53 = vadd.f32 %v1737_v38, %v1727_v10 }
 0x282   : > { %1748 = vst [vmem:[%s224_s9] sm:$0xff] %v1744_v49  ;;  %v1746_v54 = vadd.f32 %v1742_v50, %v2663_v57 }
 0x283   : > { %1749 = vst [vmem:[%s224_s9 + $0x8] sm:$0xff] %v1745_v52  ;;  %v1747_v5 = vadd.f32 %v2437_v55, %v1743_v53 }
 0x284   : > { %1750 = vst [vmem:[%s224_s9 + $0x10] sm:$0xff] %v1746_v54 }
 0x285   : > { %1751 = vst [vmem:[%s224_s9 + $0x18] sm:$0xff] %v1747_v5 }
 0x286 PF: > { %s15_s18 = sadd.s32 1, %s2444_s18  }
 0x287   : > { %p12_p4 = scmp.ge.s32.totalorder %s15_s18, 4  }
 0x289   :  { %14 = sbr.rel (!%p12_p4) target bundleno = 1 (0x1), region = 74 }

</bundles_post_ra>
